<compile_context>
chip_gen: v5e
topology: v5e:2x2
jax: 0.10.0
libtpu: 0.0.40
codegen_flags: <defaults>
</compile_context>

<pallas_src>
import math

import jax
import jax.numpy as jnp
from jax.experimental import pallas as pl
from jax.experimental.pallas import tpu as pltpu

# ----------------------------- model dims (small) ---------------------------
B = 2          # batch
S = 8          # sequence length
H = 32         # hidden size
FF = 4 * H     # feed-forward size (= 128, lane-dense)
C = 2          # num_classes
VOCAB = 100
TYPE_VOCAB = 2
LN_EPS = 1e-12

# rows in the packed "small vector" array (width FF = 128 lanes, one DMA)
(V_EMB_LN_G, V_EMB_LN_B, V_BQ, V_BK, V_BV, V_BO,
 V_LN1_G, V_LN1_B, V_B2, V_LN2_G, V_LN2_B, V_POOL_B,
 V_B1, V_CLS_B) = range(14)
N_VEC = 14

# indices into the stacked (5, H, H) weight pack
W_Q, W_K, W_V, W_O, W_POOL = range(5)

# sublane-aligned offsets inside the packed embedding table (width H)
EMB_TOK_OFF = 0
EMB_SEG_OFF = ((VOCAB + 7) // 8) * 8                       # 104
EMB_POS_OFF = ((EMB_SEG_OFF + TYPE_VOCAB + 7) // 8) * 8    # 112
EMB_ROWS = ((EMB_POS_OFF + S + 7) // 8) * 8                # 120


# ------------------------------ helpers --------------------------------------
def _layer_norm(x, g, b):
    mu = jnp.mean(x, axis=-1, keepdims=True)
    var = jnp.mean((x - mu) ** 2, axis=-1, keepdims=True)
    return (x - mu) * jax.lax.rsqrt(var + LN_EPS) * g + b


def _mm(a, b):
    # bf16 MXU operands (full rate on v6e/v7x), f32 accumulation.
    return jnp.dot(a.astype(jnp.bfloat16), b.astype(jnp.bfloat16),
                   preferred_element_type=jnp.float32)


# --------------------------- the fused kernel ---------------------------------
def _fused_kernel(tok_ref, seg_ref, vl_ref, emb_ref, wstack_ref,
                  w1_ref, w2c_ref, vec_ref, out_ref):
    f32 = jnp.float32
    bf16 = jnp.bfloat16

    # ---- unpack the lane-dense packed small vectors (single DMA) ----
    vecs = vec_ref[...]                                     # (N_VEC, FF)

    def vrow(i, w=H):
        return vecs[i:i + 1, :w]                            # (1, w)

    emb_ln_g, emb_ln_b = vrow(V_EMB_LN_G), vrow(V_EMB_LN_B)
    bq, bk, bv, bo = vrow(V_BQ), vrow(V_BK), vrow(V_BV), vrow(V_BO)
    ln1_g, ln1_b = vrow(V_LN1_G), vrow(V_LN1_B)
    b2, ln2_g, ln2_b = vrow(V_B2), vrow(V_LN2_G), vrow(V_LN2_B)
    pool_b = vrow(V_POOL_B)
    b1 = vrow(V_B1, FF)                                     # (1, FF)
    cls_b = vrow(V_CLS_B, C)                                # (1, C)

    # ---- embeddings: one-hot MXU gather from the resident table + LN ----
    tok_ids = tok_ref[...]                                  # (B*S, 1) int32
    seg_ids = seg_ref[...]                                  # (B*S, 1) int32
    tok_tbl = emb_ref[EMB_TOK_OFF:EMB_TOK_OFF + VOCAB, :]   # (VOCAB, H)
    seg_tbl = emb_ref[EMB_SEG_OFF:EMB_SEG_OFF + TYPE_VOCAB, :]
    pos_tbl = emb_ref[EMB_POS_OFF:EMB_POS_OFF + S, :]       # (S, H)

    tok_oh = (jax.lax.broadcasted_iota(jnp.int32, (B * S, VOCAB), 1)
              == tok_ids).astype(f32)
    seg_oh = (jax.lax.broadcasted_iota(jnp.int32, (B * S, TYPE_VOCAB), 1)
              == seg_ids).astype(f32)
    x = (jnp.dot(tok_oh, tok_tbl, preferred_element_type=f32)   # exact gather: f32
         + jnp.dot(seg_oh, seg_tbl, preferred_element_type=f32)
         + jnp.tile(pos_tbl, (B, 1)))                           # (B*S, H)
    x = _layer_norm(x, emb_ln_g, emb_ln_b)

    # ---- self-attention (single head); batch flattened into the M rows ----
    q = _mm(x, wstack_ref[W_Q]) + bq                        # (B*S, H)
    k = _mm(x, wstack_ref[W_K]) + bk
    v = _mm(x, wstack_ref[W_V]) + bv

    qb = q.reshape(B, S, H)
    kb = k.reshape(B, S, H)
    vb = v.reshape(B, S, H)

    # contract the last dims directly -> no explicit k.T / XLU transpose
    scores = jnp.einsum('bqd,bkd->bqk', qb.astype(bf16), kb.astype(bf16),
                        preferred_element_type=f32) * (1.0 / math.sqrt(H))

    # attention mask fused in: matches gen_attention_mask(valid_length)
    col = jax.lax.broadcasted_iota(jnp.int32, (B, S), 1)    # key position
    key_bias = jnp.where(col < vl_ref[...], 0.0, -1e9)      # (B, S) f32
    scores = scores + key_bias[:, None, :]

    scores = scores - jnp.max(scores, axis=-1, keepdims=True)
    p = jnp.exp(scores)
    p = p * pl.reciprocal(jnp.sum(p, axis=-1, keepdims=True), approx=False)

    ctx = jnp.einsum('bqk,bkd->bqd', p.astype(bf16), vb.astype(bf16),
                     preferred_element_type=f32).reshape(B * S, H)

    attn = _mm(ctx, wstack_ref[W_O]) + bo
    h1 = _layer_norm(x + attn, ln1_g, ln1_b)

    # ---- feed-forward ----
    inter = jax.nn.gelu(_mm(h1, w1_ref[...]) + b1, approximate=True)
    ffn = _mm(inter, w2c_ref[0:FF, :]) + b2
    h2 = _layer_norm(h1 + ffn, ln2_g, ln2_b)                # (B*S, H)

    # ---- pooler + dropout(identity) + classifier on the CLS rows ----
    cls_rows = h2.reshape(B, S, H)[:, 0, :]                 # (B, H)
    pooled = jnp.tanh(_mm(cls_rows, wstack_ref[W_POOL]) + pool_b)
    # TODO(synk): nn.Dropout skipped (eval / inference => identity).
    cls_w_t = w2c_ref[FF:FF + C, :]                         # (C, H)
    logits = jnp.einsum('bh,ch->bc', pooled.astype(bf16), cls_w_t.astype(bf16),
                        preferred_element_type=f32) + cls_b
    out_ref[...] = logits.astype(out_ref.dtype)


# ------------------------------ full forward ---------------------------------
@jax.jit
def bert_classifier_forward(params, token_ids, valid_length, segment_ids):
    # Single fused pallas_call, no grid: the whole (tiny) problem fits VMEM,
    # and a batch grid would only add per-step overhead on the serial TC loop.
    return pl.pallas_call(
        _fused_kernel,
        out_shape=jax.ShapeDtypeStruct((B, C), jnp.float32),
    )(token_ids.reshape(B * S, 1).astype(jnp.int32),
      segment_ids.reshape(B * S, 1).astype(jnp.int32),
      valid_length.reshape(B, 1).astype(jnp.int32),
      params["emb_pack"],
      params["w_stack"],
      params["w1"],
      params["w2c"],
      params["vec_pack"])


# ----------------------------- parameter init --------------------------------
def init_params(key):
    def nrm(k, shape, scale=0.02):
        return (scale * jax.random.normal(k, shape)).astype(jnp.float32)

    ks = jax.random.split(key, 11)
    tok_emb = nrm(ks[0], (VOCAB, H))
    seg_emb = nrm(ks[1], (TYPE_VOCAB, H))
    pos_emb = nrm(ks[2], (S, H))
    wq = nrm(ks[3], (H, H))
    wk = nrm(ks[4], (H, H))
    wv = nrm(ks[5], (H, H))
    wo = nrm(ks[6], (H, H))
    pool_w = nrm(ks[7], (H, H))
    w1 = nrm(ks[8], (H, FF))
    w2 = nrm(ks[9], (FF, H))
    cls_w = nrm(ks[10], (H, C))

    # packed embedding table (sublane-aligned sub-blocks), width H
    emb_pack = jnp.zeros((EMB_ROWS, H), jnp.float32)
    emb_pack = emb_pack.at[EMB_TOK_OFF:EMB_TOK_OFF + VOCAB].set(tok_emb)
    emb_pack = emb_pack.at[EMB_SEG_OFF:EMB_SEG_OFF + TYPE_VOCAB].set(seg_emb)
    emb_pack = emb_pack.at[EMB_POS_OFF:EMB_POS_OFF + S].set(pos_emb)

    # packed small vectors (LayerNorm gains = 1, all biases = 0), width FF
    vec_pack = jnp.zeros((N_VEC, FF), jnp.float32)
    for row in (V_EMB_LN_G, V_LN1_G, V_LN2_G):
        vec_pack = vec_pack.at[row, :H].set(1.0)

    return {
        "emb_pack": emb_pack,                               # (120, H)
        "w_stack": jnp.stack([wq, wk, wv, wo, pool_w], 0),  # (5, H, H)
        "w1": w1,                                           # (H, FF)
        "w2c": jnp.concatenate([w2, cls_w.T], axis=0),      # (FF + C, H)
        "vec_pack": vec_pack,                               # (N_VEC, FF)
    }


if __name__ == "__main__":
    key = jax.random.PRNGKey(0)
    pkey, dkey = jax.random.split(key)
    params = init_params(pkey)

    token_ids = jax.random.randint(dkey, (B, S), 0, VOCAB, dtype=jnp.int32)
    valid_length = jnp.array([5, 8], dtype=jnp.int32)
    segment_ids = jnp.zeros((B, S), dtype=jnp.int32)

    logits = bert_classifier_forward(params, token_ids, valid_length, segment_ids)
    logits = jax.block_until_ready(logits)

    assert logits.shape == (B, C), logits.shape
    assert logits.dtype == jnp.float32
    print("KERNEL_OK")
</pallas_src>

<mosaic_0001>
module attributes {stable_mosaic.version = 11 : i64} {
  func.func @_fused_kernel(%arg0: memref<16x1xi32, #tpu.memory_space<vmem>>, %arg1: memref<16x1xi32, #tpu.memory_space<vmem>>, %arg2: memref<2x1xi32, #tpu.memory_space<vmem>>, %arg3: memref<120x32xf32, #tpu.memory_space<vmem>>, %arg4: memref<5x32x32xf32, #tpu.memory_space<vmem>>, %arg5: memref<32x128xf32, #tpu.memory_space<vmem>>, %arg6: memref<130x32xf32, #tpu.memory_space<vmem>>, %arg7: memref<14x128xf32, #tpu.memory_space<vmem>>, %arg8: memref<2x2xf32, #tpu.memory_space<vmem>>) attributes {dimension_semantics = [], scalar_prefetch = 0 : i64, scratch_operands = 0 : i64, tpu.core_type = #tpu.core_type<tc>} {
    %c0 = arith.constant 0 : index
    %c0_0 = arith.constant 0 : index
    %0 = vector.load %arg7[%c0, %c0_0] : memref<14x128xf32, #tpu.memory_space<vmem>>, vector<14x128xf32>
    %1 = vector.extract_strided_slice %0 {offsets = [0, 0], sizes = [1, 32], strides = [1, 1]} : vector<14x128xf32> to vector<1x32xf32>
    %2 = vector.extract_strided_slice %0 {offsets = [1, 0], sizes = [1, 32], strides = [1, 1]} : vector<14x128xf32> to vector<1x32xf32>
    %3 = vector.extract_strided_slice %0 {offsets = [2, 0], sizes = [1, 32], strides = [1, 1]} : vector<14x128xf32> to vector<1x32xf32>
    %4 = vector.extract_strided_slice %0 {offsets = [3, 0], sizes = [1, 32], strides = [1, 1]} : vector<14x128xf32> to vector<1x32xf32>
    %5 = vector.extract_strided_slice %0 {offsets = [4, 0], sizes = [1, 32], strides = [1, 1]} : vector<14x128xf32> to vector<1x32xf32>
    %6 = vector.extract_strided_slice %0 {offsets = [5, 0], sizes = [1, 32], strides = [1, 1]} : vector<14x128xf32> to vector<1x32xf32>
    %7 = vector.extract_strided_slice %0 {offsets = [6, 0], sizes = [1, 32], strides = [1, 1]} : vector<14x128xf32> to vector<1x32xf32>
    %8 = vector.extract_strided_slice %0 {offsets = [7, 0], sizes = [1, 32], strides = [1, 1]} : vector<14x128xf32> to vector<1x32xf32>
    %9 = vector.extract_strided_slice %0 {offsets = [8, 0], sizes = [1, 32], strides = [1, 1]} : vector<14x128xf32> to vector<1x32xf32>
    %10 = vector.extract_strided_slice %0 {offsets = [9, 0], sizes = [1, 32], strides = [1, 1]} : vector<14x128xf32> to vector<1x32xf32>
    %11 = vector.extract_strided_slice %0 {offsets = [10, 0], sizes = [1, 32], strides = [1, 1]} : vector<14x128xf32> to vector<1x32xf32>
    %12 = vector.extract_strided_slice %0 {offsets = [11, 0], sizes = [1, 32], strides = [1, 1]} : vector<14x128xf32> to vector<1x32xf32>
    %13 = vector.extract_strided_slice %0 {offsets = [12, 0], sizes = [1, 128], strides = [1, 1]} : vector<14x128xf32> to vector<1x128xf32>
    %14 = vector.extract_strided_slice %0 {offsets = [13, 0], sizes = [1, 2], strides = [1, 1]} : vector<14x128xf32> to vector<1x2xf32>
    %c0_1 = arith.constant 0 : index
    %c0_2 = arith.constant 0 : index
    %15 = vector.load %arg0[%c0_1, %c0_2] : memref<16x1xi32, #tpu.memory_space<vmem>>, vector<16x1xi32>
    %c0_3 = arith.constant 0 : index
    %c0_4 = arith.constant 0 : index
    %16 = vector.load %arg1[%c0_3, %c0_4] : memref<16x1xi32, #tpu.memory_space<vmem>>, vector<16x1xi32>
    %c0_5 = arith.constant 0 : index
    %c0_6 = arith.constant 0 : index
    %17 = vector.load %arg3[%c0_5, %c0_6] : memref<120x32xf32, #tpu.memory_space<vmem>>, vector<100x32xf32>
    %c104 = arith.constant 104 : index
    %c0_7 = arith.constant 0 : index
    %18 = vector.load %arg3[%c104, %c0_7] : memref<120x32xf32, #tpu.memory_space<vmem>>, vector<2x32xf32>
    %c112 = arith.constant 112 : index
    %c0_8 = arith.constant 0 : index
    %19 = vector.load %arg3[%c112, %c0_8] : memref<120x32xf32, #tpu.memory_space<vmem>>, vector<8x32xf32>
    %20 = tpu.iota {dimensions = array<i32: 1>} : vector<16x100xi32>
    %21 = vector.broadcast %15 : vector<16x1xi32> to vector<16x100xi32>
    %22 = arith.cmpi eq, %20, %21 : vector<16x100xi32>
    %23 = arith.extui %22 : vector<16x100xi1> to vector<16x100xi32>
    %24 = arith.sitofp %23 : vector<16x100xi32> to vector<16x100xf32>
    %25 = tpu.iota {dimensions = array<i32: 1>} : vector<16x2xi32>
    %26 = vector.broadcast %16 : vector<16x1xi32> to vector<16x2xi32>
    %27 = arith.cmpi eq, %25, %26 : vector<16x2xi32>
    %28 = arith.extui %27 : vector<16x2xi1> to vector<16x2xi32>
    %29 = arith.sitofp %28 : vector<16x2xi32> to vector<16x2xf32>
    %cst = arith.constant dense<0.000000e+00> : vector<16x32xf32>
    %30 = tpu.matmul %24, %17, %cst {dimension_numbers = #tpu.dot_dimension_numbers<[1], [0], [0], [1], [0, 0, 1, 1], [], []>} : vector<16x100xf32>, vector<100x32xf32>, vector<16x32xf32> -> vector<16x32xf32>
    %cst_9 = arith.constant dense<0.000000e+00> : vector<16x32xf32>
    %31 = tpu.matmul %29, %18, %cst_9 {dimension_numbers = #tpu.dot_dimension_numbers<[1], [0], [0], [1], [0, 0, 1, 1], [], []>} : vector<16x2xf32>, vector<2x32xf32>, vector<16x32xf32> -> vector<16x32xf32>
    %32 = arith.addf %30, %31 : vector<16x32xf32>
    %33 = tpu.concatenate %19, %19 in 0 : vector<8x32xf32>, vector<8x32xf32> -> vector<16x32xf32>
    %34 = arith.addf %32, %33 : vector<16x32xf32>
    %cst_10 = arith.constant dense<0.000000e+00> : vector<16xf32>
    %35 = vector.multi_reduction <add>, %34, %cst_10 [1] : vector<16x32xf32> to vector<16xf32>
    %36 = vector.shape_cast %35 : vector<16xf32> to vector<16x1xf32>
    %cst_11 = arith.constant 3.200000e+01 : f32
    %37 = vector.broadcast %cst_11 : f32 to vector<16x1xf32>
    %38 = arith.divf %36, %37 : vector<16x1xf32>
    %39 = vector.broadcast %38 : vector<16x1xf32> to vector<16x32xf32>
    %40 = arith.subf %34, %39 : vector<16x32xf32>
    %41 = arith.mulf %40, %40 : vector<16x32xf32>
    %cst_12 = arith.constant dense<0.000000e+00> : vector<16xf32>
    %42 = vector.multi_reduction <add>, %41, %cst_12 [1] : vector<16x32xf32> to vector<16xf32>
    %43 = vector.shape_cast %42 : vector<16xf32> to vector<16x1xf32>
    %cst_13 = arith.constant 3.200000e+01 : f32
    %44 = vector.broadcast %cst_13 : f32 to vector<16x1xf32>
    %45 = arith.divf %43, %44 : vector<16x1xf32>
    %46 = vector.broadcast %38 : vector<16x1xf32> to vector<16x32xf32>
    %47 = arith.subf %34, %46 : vector<16x32xf32>
    %cst_14 = arith.constant 9.99999996E-13 : f32
    %48 = vector.broadcast %cst_14 : f32 to vector<16x1xf32>
    %49 = arith.addf %45, %48 : vector<16x1xf32>
    %50 = math.rsqrt %49 : vector<16x1xf32>
    %51 = vector.broadcast %50 : vector<16x1xf32> to vector<16x32xf32>
    %52 = arith.mulf %47, %51 : vector<16x32xf32>
    %53 = vector.broadcast %1 : vector<1x32xf32> to vector<16x32xf32>
    %54 = arith.mulf %52, %53 : vector<16x32xf32>
    %55 = vector.broadcast %2 : vector<1x32xf32> to vector<16x32xf32>
    %56 = arith.addf %54, %55 : vector<16x32xf32>
    %c0_15 = arith.constant 0 : index
    %c0_16 = arith.constant 0 : index
    %c0_17 = arith.constant 0 : index
    %57 = vector.load %arg4[%c0_15, %c0_16, %c0_17] : memref<5x32x32xf32, #tpu.memory_space<vmem>>, vector<1x32x32xf32>
    %58 = vector.shape_cast %57 : vector<1x32x32xf32> to vector<32x32xf32>
    %59 = arith.truncf %56 : vector<16x32xf32> to vector<16x32xbf16>
    %60 = arith.truncf %58 : vector<32x32xf32> to vector<32x32xbf16>
    %cst_18 = arith.constant dense<0.000000e+00> : vector<16x32xf32>
    %61 = tpu.matmul %59, %60, %cst_18 {dimension_numbers = #tpu.dot_dimension_numbers<[1], [0], [0], [1], [0, 0, 1, 1], [], []>} : vector<16x32xbf16>, vector<32x32xbf16>, vector<16x32xf32> -> vector<16x32xf32>
    %62 = vector.broadcast %3 : vector<1x32xf32> to vector<16x32xf32>
    %63 = arith.addf %61, %62 : vector<16x32xf32>
    %c1 = arith.constant 1 : index
    %c0_19 = arith.constant 0 : index
    %c0_20 = arith.constant 0 : index
    %64 = vector.load %arg4[%c1, %c0_19, %c0_20] : memref<5x32x32xf32, #tpu.memory_space<vmem>>, vector<1x32x32xf32>
    %65 = vector.shape_cast %64 : vector<1x32x32xf32> to vector<32x32xf32>
    %66 = arith.truncf %56 : vector<16x32xf32> to vector<16x32xbf16>
    %67 = arith.truncf %65 : vector<32x32xf32> to vector<32x32xbf16>
    %cst_21 = arith.constant dense<0.000000e+00> : vector<16x32xf32>
    %68 = tpu.matmul %66, %67, %cst_21 {dimension_numbers = #tpu.dot_dimension_numbers<[1], [0], [0], [1], [0, 0, 1, 1], [], []>} : vector<16x32xbf16>, vector<32x32xbf16>, vector<16x32xf32> -> vector<16x32xf32>
    %69 = vector.broadcast %4 : vector<1x32xf32> to vector<16x32xf32>
    %70 = arith.addf %68, %69 : vector<16x32xf32>
    %c2 = arith.constant 2 : index
    %c0_22 = arith.constant 0 : index
    %c0_23 = arith.constant 0 : index
    %71 = vector.load %arg4[%c2, %c0_22, %c0_23] : memref<5x32x32xf32, #tpu.memory_space<vmem>>, vector<1x32x32xf32>
    %72 = vector.shape_cast %71 : vector<1x32x32xf32> to vector<32x32xf32>
    %73 = arith.truncf %56 : vector<16x32xf32> to vector<16x32xbf16>
    %74 = arith.truncf %72 : vector<32x32xf32> to vector<32x32xbf16>
    %cst_24 = arith.constant dense<0.000000e+00> : vector<16x32xf32>
    %75 = tpu.matmul %73, %74, %cst_24 {dimension_numbers = #tpu.dot_dimension_numbers<[1], [0], [0], [1], [0, 0, 1, 1], [], []>} : vector<16x32xbf16>, vector<32x32xbf16>, vector<16x32xf32> -> vector<16x32xf32>
    %76 = vector.broadcast %5 : vector<1x32xf32> to vector<16x32xf32>
    %77 = arith.addf %75, %76 : vector<16x32xf32>
    %78 = vector.shape_cast %63 : vector<16x32xf32> to vector<2x8x32xf32>
    %79 = vector.shape_cast %70 : vector<16x32xf32> to vector<2x8x32xf32>
    %80 = vector.shape_cast %77 : vector<16x32xf32> to vector<2x8x32xf32>
    %81 = arith.truncf %78 : vector<2x8x32xf32> to vector<2x8x32xbf16>
    %82 = arith.truncf %79 : vector<2x8x32xf32> to vector<2x8x32xbf16>
    "tpu.trace_start"() <{level = 10 : i32, message = "bqd,bkd->bqk"}> : () -> ()
    %cst_25 = arith.constant dense<0.000000e+00> : vector<2x8x8xf32>
    %83 = tpu.matmul %81, %82, %cst_25 {dimension_numbers = #tpu.dot_dimension_numbers<[2], [2], [1], [1], [0, 0, 0, 1, 1, 1], [0], [0]>} : vector<2x8x32xbf16>, vector<2x8x32xbf16>, vector<2x8x8xf32> -> vector<2x8x8xf32>
    "tpu.trace_stop"() : () -> ()
    %cst_26 = arith.constant 0.176776692 : f32
    %84 = vector.broadcast %cst_26 : f32 to vector<2x8x8xf32>
    %85 = arith.mulf %83, %84 : vector<2x8x8xf32>
    %86 = tpu.iota {dimensions = array<i32: 1>} : vector<2x8xi32>
    %c0_27 = arith.constant 0 : index
    %c0_28 = arith.constant 0 : index
    %87 = vector.load %arg2[%c0_27, %c0_28] : memref<2x1xi32, #tpu.memory_space<vmem>>, vector<2x1xi32>
    %88 = vector.broadcast %87 : vector<2x1xi32> to vector<2x8xi32>
    %89 = arith.cmpi slt, %86, %88 : vector<2x8xi32>
    %cst_29 = arith.constant 0.000000e+00 : f32
    %cst_30 = arith.constant -1.000000e+09 : f32
    %90 = vector.broadcast %cst_29 : f32 to vector<2x8xf32>
    %91 = vector.broadcast %cst_30 : f32 to vector<2x8xf32>
    %92 = arith.select %89, %90, %91 : vector<2x8xi1>, vector<2x8xf32>
    %93 = vector.shape_cast %92 : vector<2x8xf32> to vector<2x1x8xf32>
    %94 = vector.broadcast %93 : vector<2x1x8xf32> to vector<2x8x8xf32>
    %95 = arith.addf %85, %94 : vector<2x8x8xf32>
    %cst_31 = arith.constant dense<0xFF800000> : vector<2x8xf32>
    %96 = vector.multi_reduction <maximumf>, %95, %cst_31 [2] : vector<2x8x8xf32> to vector<2x8xf32>
    %97 = vector.shape_cast %96 : vector<2x8xf32> to vector<2x8x1xf32>
    %98 = vector.broadcast %97 : vector<2x8x1xf32> to vector<2x8x8xf32>
    %99 = arith.subf %95, %98 : vector<2x8x8xf32>
    %100 = math.exp %99 : vector<2x8x8xf32>
    %cst_32 = arith.constant dense<0.000000e+00> : vector<2x8xf32>
    %101 = vector.multi_reduction <add>, %100, %cst_32 [2] : vector<2x8x8xf32> to vector<2x8xf32>
    %102 = vector.shape_cast %101 : vector<2x8xf32> to vector<2x8x1xf32>
    %103 = tpu.reciprocal %102 : vector<2x8x1xf32> -> vector<2x8x1xf32>
    %104 = vector.broadcast %103 : vector<2x8x1xf32> to vector<2x8x8xf32>
    %105 = arith.mulf %100, %104 : vector<2x8x8xf32>
    %106 = arith.truncf %105 : vector<2x8x8xf32> to vector<2x8x8xbf16>
    %107 = arith.truncf %80 : vector<2x8x32xf32> to vector<2x8x32xbf16>
    "tpu.trace_start"() <{level = 10 : i32, message = "bqk,bkd->bqd"}> : () -> ()
    %cst_33 = arith.constant dense<0.000000e+00> : vector<2x8x32xf32>
    %108 = tpu.matmul %106, %107, %cst_33 {dimension_numbers = #tpu.dot_dimension_numbers<[2], [1], [1], [2], [0, 0, 0, 1, 1, 2], [0], [0]>} : vector<2x8x8xbf16>, vector<2x8x32xbf16>, vector<2x8x32xf32> -> vector<2x8x32xf32>
    "tpu.trace_stop"() : () -> ()
    %109 = vector.shape_cast %108 : vector<2x8x32xf32> to vector<16x32xf32>
    %c3 = arith.constant 3 : index
    %c0_34 = arith.constant 0 : index
    %c0_35 = arith.constant 0 : index
    %110 = vector.load %arg4[%c3, %c0_34, %c0_35] : memref<5x32x32xf32, #tpu.memory_space<vmem>>, vector<1x32x32xf32>
    %111 = vector.shape_cast %110 : vector<1x32x32xf32> to vector<32x32xf32>
    %112 = arith.truncf %109 : vector<16x32xf32> to vector<16x32xbf16>
    %113 = arith.truncf %111 : vector<32x32xf32> to vector<32x32xbf16>
    %cst_36 = arith.constant dense<0.000000e+00> : vector<16x32xf32>
    %114 = tpu.matmul %112, %113, %cst_36 {dimension_numbers = #tpu.dot_dimension_numbers<[1], [0], [0], [1], [0, 0, 1, 1], [], []>} : vector<16x32xbf16>, vector<32x32xbf16>, vector<16x32xf32> -> vector<16x32xf32>
    %115 = vector.broadcast %6 : vector<1x32xf32> to vector<16x32xf32>
    %116 = arith.addf %114, %115 : vector<16x32xf32>
    %117 = arith.addf %56, %116 : vector<16x32xf32>
    %cst_37 = arith.constant dense<0.000000e+00> : vector<16xf32>
    %118 = vector.multi_reduction <add>, %117, %cst_37 [1] : vector<16x32xf32> to vector<16xf32>
    %119 = vector.shape_cast %118 : vector<16xf32> to vector<16x1xf32>
    %cst_38 = arith.constant 3.200000e+01 : f32
    %120 = vector.broadcast %cst_38 : f32 to vector<16x1xf32>
    %121 = arith.divf %119, %120 : vector<16x1xf32>
    %122 = vector.broadcast %121 : vector<16x1xf32> to vector<16x32xf32>
    %123 = arith.subf %117, %122 : vector<16x32xf32>
    %124 = arith.mulf %123, %123 : vector<16x32xf32>
    %cst_39 = arith.constant dense<0.000000e+00> : vector<16xf32>
    %125 = vector.multi_reduction <add>, %124, %cst_39 [1] : vector<16x32xf32> to vector<16xf32>
    %126 = vector.shape_cast %125 : vector<16xf32> to vector<16x1xf32>
    %cst_40 = arith.constant 3.200000e+01 : f32
    %127 = vector.broadcast %cst_40 : f32 to vector<16x1xf32>
    %128 = arith.divf %126, %127 : vector<16x1xf32>
    %129 = vector.broadcast %121 : vector<16x1xf32> to vector<16x32xf32>
    %130 = arith.subf %117, %129 : vector<16x32xf32>
    %cst_41 = arith.constant 9.99999996E-13 : f32
    %131 = vector.broadcast %cst_41 : f32 to vector<16x1xf32>
    %132 = arith.addf %128, %131 : vector<16x1xf32>
    %133 = math.rsqrt %132 : vector<16x1xf32>
    %134 = vector.broadcast %133 : vector<16x1xf32> to vector<16x32xf32>
    %135 = arith.mulf %130, %134 : vector<16x32xf32>
    %136 = vector.broadcast %7 : vector<1x32xf32> to vector<16x32xf32>
    %137 = arith.mulf %135, %136 : vector<16x32xf32>
    %138 = vector.broadcast %8 : vector<1x32xf32> to vector<16x32xf32>
    %139 = arith.addf %137, %138 : vector<16x32xf32>
    %c0_42 = arith.constant 0 : index
    %c0_43 = arith.constant 0 : index
    %140 = vector.load %arg5[%c0_42, %c0_43] : memref<32x128xf32, #tpu.memory_space<vmem>>, vector<32x128xf32>
    %141 = arith.truncf %139 : vector<16x32xf32> to vector<16x32xbf16>
    %142 = arith.truncf %140 : vector<32x128xf32> to vector<32x128xbf16>
    %cst_44 = arith.constant dense<0.000000e+00> : vector<16x128xf32>
    %143 = tpu.matmul %141, %142, %cst_44 {dimension_numbers = #tpu.dot_dimension_numbers<[1], [0], [0], [1], [0, 0, 1, 1], [], []>} : vector<16x32xbf16>, vector<32x128xbf16>, vector<16x128xf32> -> vector<16x128xf32>
    %144 = vector.broadcast %13 : vector<1x128xf32> to vector<16x128xf32>
    %145 = arith.addf %143, %144 : vector<16x128xf32>
    %146 = arith.mulf %145, %145 : vector<16x128xf32>
    %147 = arith.mulf %145, %146 : vector<16x128xf32>
    %cst_45 = arith.constant 4.471500e-02 : f32
    %148 = vector.broadcast %cst_45 : f32 to vector<16x128xf32>
    %149 = arith.mulf %148, %147 : vector<16x128xf32>
    %150 = arith.addf %145, %149 : vector<16x128xf32>
    %cst_46 = arith.constant 0.797884583 : f32
    %151 = vector.broadcast %cst_46 : f32 to vector<16x128xf32>
    %152 = arith.mulf %151, %150 : vector<16x128xf32>
    %153 = math.tanh %152 : vector<16x128xf32>
    %cst_47 = arith.constant 1.000000e+00 : f32
    %154 = vector.broadcast %cst_47 : f32 to vector<16x128xf32>
    %155 = arith.addf %154, %153 : vector<16x128xf32>
    %cst_48 = arith.constant 5.000000e-01 : f32
    %156 = vector.broadcast %cst_48 : f32 to vector<16x128xf32>
    %157 = arith.mulf %156, %155 : vector<16x128xf32>
    %158 = arith.mulf %145, %157 : vector<16x128xf32>
    %c0_49 = arith.constant 0 : index
    %c0_50 = arith.constant 0 : index
    %159 = vector.load %arg6[%c0_49, %c0_50] : memref<130x32xf32, #tpu.memory_space<vmem>>, vector<128x32xf32>
    %160 = arith.truncf %158 : vector<16x128xf32> to vector<16x128xbf16>
    %161 = arith.truncf %159 : vector<128x32xf32> to vector<128x32xbf16>
    %cst_51 = arith.constant dense<0.000000e+00> : vector<16x32xf32>
    %162 = tpu.matmul %160, %161, %cst_51 {dimension_numbers = #tpu.dot_dimension_numbers<[1], [0], [0], [1], [0, 0, 1, 1], [], []>} : vector<16x128xbf16>, vector<128x32xbf16>, vector<16x32xf32> -> vector<16x32xf32>
    %163 = vector.broadcast %9 : vector<1x32xf32> to vector<16x32xf32>
    %164 = arith.addf %162, %163 : vector<16x32xf32>
    %165 = arith.addf %139, %164 : vector<16x32xf32>
    %cst_52 = arith.constant dense<0.000000e+00> : vector<16xf32>
    %166 = vector.multi_reduction <add>, %165, %cst_52 [1] : vector<16x32xf32> to vector<16xf32>
    %167 = vector.shape_cast %166 : vector<16xf32> to vector<16x1xf32>
    %cst_53 = arith.constant 3.200000e+01 : f32
    %168 = vector.broadcast %cst_53 : f32 to vector<16x1xf32>
    %169 = arith.divf %167, %168 : vector<16x1xf32>
    %170 = vector.broadcast %169 : vector<16x1xf32> to vector<16x32xf32>
    %171 = arith.subf %165, %170 : vector<16x32xf32>
    %172 = arith.mulf %171, %171 : vector<16x32xf32>
    %cst_54 = arith.constant dense<0.000000e+00> : vector<16xf32>
    %173 = vector.multi_reduction <add>, %172, %cst_54 [1] : vector<16x32xf32> to vector<16xf32>
    %174 = vector.shape_cast %173 : vector<16xf32> to vector<16x1xf32>
    %cst_55 = arith.constant 3.200000e+01 : f32
    %175 = vector.broadcast %cst_55 : f32 to vector<16x1xf32>
    %176 = arith.divf %174, %175 : vector<16x1xf32>
    %177 = vector.broadcast %169 : vector<16x1xf32> to vector<16x32xf32>
    %178 = arith.subf %165, %177 : vector<16x32xf32>
    %cst_56 = arith.constant 9.99999996E-13 : f32
    %179 = vector.broadcast %cst_56 : f32 to vector<16x1xf32>
    %180 = arith.addf %176, %179 : vector<16x1xf32>
    %181 = math.rsqrt %180 : vector<16x1xf32>
    %182 = vector.broadcast %181 : vector<16x1xf32> to vector<16x32xf32>
    %183 = arith.mulf %178, %182 : vector<16x32xf32>
    %184 = vector.broadcast %10 : vector<1x32xf32> to vector<16x32xf32>
    %185 = arith.mulf %183, %184 : vector<16x32xf32>
    %186 = vector.broadcast %11 : vector<1x32xf32> to vector<16x32xf32>
    %187 = arith.addf %185, %186 : vector<16x32xf32>
    %188 = vector.shape_cast %187 : vector<16x32xf32> to vector<2x8x32xf32>
    %189 = vector.extract_strided_slice %188 {offsets = [0, 0, 0], sizes = [2, 1, 32], strides = [1, 1, 1]} : vector<2x8x32xf32> to vector<2x1x32xf32>
    %190 = vector.shape_cast %189 : vector<2x1x32xf32> to vector<2x32xf32>
    %c4 = arith.constant 4 : index
    %c0_57 = arith.constant 0 : index
    %c0_58 = arith.constant 0 : index
    %191 = vector.load %arg4[%c4, %c0_57, %c0_58] : memref<5x32x32xf32, #tpu.memory_space<vmem>>, vector<1x32x32xf32>
    %192 = vector.shape_cast %191 : vector<1x32x32xf32> to vector<32x32xf32>
    %193 = arith.truncf %190 : vector<2x32xf32> to vector<2x32xbf16>
    %194 = arith.truncf %192 : vector<32x32xf32> to vector<32x32xbf16>
    %cst_59 = arith.constant dense<0.000000e+00> : vector<2x32xf32>
    %195 = tpu.matmul %193, %194, %cst_59 {dimension_numbers = #tpu.dot_dimension_numbers<[1], [0], [0], [1], [0, 0, 1, 1], [], []>} : vector<2x32xbf16>, vector<32x32xbf16>, vector<2x32xf32> -> vector<2x32xf32>
    %196 = vector.broadcast %12 : vector<1x32xf32> to vector<2x32xf32>
    %197 = arith.addf %195, %196 : vector<2x32xf32>
    %198 = math.tanh %197 : vector<2x32xf32>
    %c128 = arith.constant 128 : index
    %c0_60 = arith.constant 0 : index
    %199 = vector.load %arg6[%c128, %c0_60] : memref<130x32xf32, #tpu.memory_space<vmem>>, vector<2x32xf32>
    %200 = arith.truncf %198 : vector<2x32xf32> to vector<2x32xbf16>
    %201 = arith.truncf %199 : vector<2x32xf32> to vector<2x32xbf16>
    "tpu.trace_start"() <{level = 10 : i32, message = "bh,ch->bc"}> : () -> ()
    %cst_61 = arith.constant dense<0.000000e+00> : vector<2x2xf32>
    %202 = tpu.matmul %200, %201, %cst_61 {dimension_numbers = #tpu.dot_dimension_numbers<[1], [1], [0], [0], [0, 0, 1, 0], [], []>} : vector<2x32xbf16>, vector<2x32xbf16>, vector<2x2xf32> -> vector<2x2xf32>
    "tpu.trace_stop"() : () -> ()
    %203 = vector.broadcast %14 : vector<1x2xf32> to vector<2x2xf32>
    %204 = arith.addf %202, %203 : vector<2x2xf32>
    %c0_62 = arith.constant 0 : index
    %c0_63 = arith.constant 0 : index
    %205 = vector.load %arg8[%c0_62, %c0_63] : memref<2x2xf32, #tpu.memory_space<vmem>>, vector<2x2xf32>
    tpu.vector_store %arg8[%c0_62, %c0_63], %204 {strides = array<i32>} : memref<2x2xf32, #tpu.memory_space<vmem>>, vector<2x2xf32>,
    return
  }
}

</mosaic_0001>

<bundles_post_ra>
// kernel: bert_classifier_forward.1
= control target key start
LH: loop header
LB: loop body
LE: loop exit
PB: predicated region body
PF: predicated region fallthrough
CT: control target
= control target key end

     0   :  { %vm85_vm0 = vcmask 1041408   ;;  %v812_v2 = vmov 0   ;;  %vm119_vm1 = vcmask 1043456   ;;  %s1142_s0 = inlined_call_operand.vmem [shape: s32[16,1], index: 0, kind: input, shape index: {}]   ;;  %s1143_s1 = inlined_call_operand.vmem [shape: s32[16,1], index: 1, kind: input, shape index: {}]   ;;  %s1144_s2 = inlined_call_operand.vmem [shape: s32[2,1], index: 2, kind: input, shape index: {}]   ;;  %s1145_s3 = inlined_call_operand.vmem [shape: f32[120,32], index: 3, kind: input, shape index: {}]   ;;  %s1146_s4 = inlined_call_operand.vmem [shape: f32[5,32,32], index: 4, kind: input, shape index: {}]   ;;  %s1147_s5 = inlined_call_operand.vmem [shape: f32[32,128], index: 5, kind: input, shape index: {}]   ;;  %s1148_s6 = inlined_call_operand.vmem [shape: f32[130,32], index: 6, kind: input, shape index: {}]   ;;  %s1149_s7 = inlined_call_operand.vmem [shape: f32[14,128], index: 7, kind: input, shape index: {}]   ;;  %s1150_s8 = inlined_call_operand.hbm [shape: f32[2,2], index: 8, kind: output, shape index: {}]  }
   0x1   :  { %v35_v0 = vld [vmem:[%s1143_s1] sm:$0xff]  ;;  %755 = vset.pattern.permute.xlu0 %v812_v2  ;;  %756 = vset.pattern.permute.xlu1 %v812_v2  ;;  %v50_v3 = vld [vmem:[%s1145_s3 + $0x68] sm:$0x3]  ;;  %v48_v5 = vld [vmem:[%s1145_s3 + $0x58] sm:$0xff] }
   0x2   :  { %v33_v1 = vld [vmem:[%s1142_s0] sm:$0xff]  ;;  %67 = vperm.xlu0 %755, %v35_v0   ;;  %717 = vmatpush.msk.msra.mxu1 %vm85_vm0, %v50_v3 }
   0x3   :  { %v49_v4 = vld [vmem:[%s1145_s3 + $0x60] sm:$0xf]  ;;  %55 = vperm.xlu1 %756, %v33_v1   ;;  %757 = vset.pattern.permute.xlu2 %v812_v2 }
   0x4   :  { %13 = vsyncpa [#allocation3], 0  ;;  %720 = vmatpush.msk.msrb.mxu1 %vm119_vm1, %v49_v4  ;;  %v47_v6 = vld [vmem:[%s1145_s3 + $0x50] sm:$0xff]  ;;  %v36_v7 = vld [vmem:[%s1143_s1 + $0x8] sm:$0xff]  ;;  %v52_v19 = vlaneseq  ;;  %vm78_vm2 = vcmask 15360   ;;  %v813_v22 = vmov 0.0  }
   0x5   :  { %v34_v8 = vld [vmem:[%s1142_s0 + $0x8] sm:$0xff]  ;;  %v45_v10 = vld [vmem:[%s1145_s3 + $0x40] sm:$0xff]  ;;  %v44_v11 = vld [vmem:[%s1145_s3 + $0x38] sm:$0xff]  ;;  %vm112_vm6 = vcmask 818176   ;;  %vm148_vm8 = vcmask 261120   ;;  %v814_v41 = vmov 32.0  }
   0x6   :  { %127 = vmatpush.msrb.mxu1 %v48_v5  ;;  %v46_v9 = vld [vmem:[%s1145_s3 + $0x48] sm:$0xff]  ;;  %v43_v12 = vld [vmem:[%s1145_s3 + $0x30] sm:$0xff]  ;;  %v41_v14 = vld [vmem:[%s1145_s3 + $0x20] sm:$0xff]  ;;  %v917_v20 = vand.u32 127, %v52_v19  ;;  %758 = vrcp.f32 %v814_v41  ;;  %s816_s24 = smov [#allocation2]   ;;  %s704_s1 = sshll.u32 %s1150_s8, 4  ;;  %s705_s1 = int_to_ptr.hbm [resolvable:$true] %s704_s1 }
   0x7   :  { %v42_v13 = vld [vmem:[%s1145_s3 + $0x28] sm:$0xff]  ;;  %v40_v15 = vld [vmem:[%s1145_s3 + $0x18] sm:$0xff]  ;;  %v39_v16 = vld [vmem:[%s1145_s3 + $0x10] sm:$0xff]  ;;  %s702_s25 = sshll.u32 %s816_s24, 4  ;;  %s703_s25 = int_to_ptr.vmem [resolvable:$true] %s702_s25 }
   0x8   :  { %128 = vmatpush.msrb.mxu1 %v47_v6  ;;  %v38_v17 = vld [vmem:[%s1145_s3 + $0x8] sm:$0xff]  ;;  %v37_v18 = vld [vmem:[%s1145_s3] sm:$0xff]  ;;  %v51_v33 = vld [vmem:[%s1145_s3 + $0x70] sm:$0xff] }
   0x9   :  { %v208_v58 = vld [vmem:[%s1146_s4 + $0x10] sm:$0xff]  ;;  %v209_v59 = vld [vmem:[%s1146_s4 + $0x18] sm:$0xff]  ;;  %v206_v3 = vld [vmem:[%s1146_s4] sm:$0xff] }
   0xa   :  { %70 = vperm.xlu0 %755, %v36_v7   ;;  %129 = vmatpush.msrb.mxu1 %v46_v9  ;;  %v726_v60 = vld [vmem:[%s1146_s4 + $0x30] sm:$0xff]  ;;  %v212_v61 = vpack.c.bf16 %v209_v59, %v208_v58  ;;  %v727_v62 = vld [vmem:[%s1146_s4 + $0x38] sm:$0xff]  ;;  %v207_v4 = vld [vmem:[%s1146_s4 + $0x8] sm:$0xff] }
   0xb   :  { %58 = vperm.xlu1 %756, %v34_v8   ;;  %v731_v63 = vld [vmem:[%s1146_s4 + $0x50] sm:$0xff]  ;;  %v732_v0 = vld [vmem:[%s1146_s4 + $0x58] sm:$0xff]  ;;  %v237_v1 = vpack.c.bf16 %v727_v62, %v726_v60  ;;  %v724_v5 = vld [vmem:[%s1146_s4 + $0x20] sm:$0xff]  ;;  %v211_v7 = vpack.c.bf16 %v207_v4, %v206_v3 }
   0xc   :  { %130 = vmatpush.msrb.mxu1 %v45_v10  ;;  %v759_v42 = vpop.eup %758  ;;  %v259_v2 = vpack.c.bf16 %v732_v0, %v731_v63  ;;  %223 = vmatpush.bf16.msra.mxu2 %v212_v61  ;;  %v725_v8 = vld [vmem:[%s1146_s4 + $0x28] sm:$0xff]  ;;  %v729_v9 = vld [vmem:[%s1146_s4 + $0x40] sm:$0xff] }
   0xd   :  { %v156_v43 = vmul.f32 32.0, %v759_v42  ;;  %vm160_vm9 = vweird.f32 %v759_v42  ;;  %v730_v10 = vld [vmem:[%s1146_s4 + $0x48] sm:$0xff]  ;;  %245 = vmatpush.bf16.msra.mxu3 %v237_v1 }
   0xe   :  { %131 = vmatpush.msrb.mxu1 %v44_v11  ;;  %267 = vmatpush.bf16.msra.mxu0 %v259_v2 }
   0xf   :  { %v157_v44 = vsub.f32 1.0, %v156_v43  ;;  %v319_v43 = vld [vmem:[%s1144_s2] sm:$0x3] }
  0x10   :  { %132 = vmatpush.msrb.mxu1 %v43_v12  ;;  %v236_v12 = vpack.c.bf16 %v725_v8, %v724_v5  ;;  %224 = vmatpush.bf16.msra.mxu2 %v211_v7  ;;  %v815_v7 = vmov -1e+09  }
  0x11   :  { %v158_v45 = vmul.f32 %v759_v42, %v157_v44 }
  0x12   :  { %133 = vmatpush.msrb.mxu1 %v42_v13  ;;  %v258_v13 = vpack.c.bf16 %v730_v10, %v729_v9  ;;  %246 = vmatpush.bf16.msra.mxu3 %v236_v12 }
  0x13   :  { %v159_v46 = vadd.f32 %v759_v42, %v158_v45 }
  0x14   :  { %134 = vmatpush.msrb.mxu1 %v41_v14  ;;  %268 = vmatpush.bf16.msra.mxu0 %v258_v13 }
  0x15   :  { %v928_v47 = vsel %vm160_vm9, %v759_v42, %v159_v46 }
  0x16   :  { %135 = vmatpush.msrb.mxu1 %v40_v15 }
  0x18   :  { %136 = vmatpush.msrb.mxu1 %v39_v16 }
  0x1a   :  { %137 = vmatpush.msrb.mxu1 %v38_v17 }
  0x1c   :  { %138 = vmatpush.msrb.mxu1 %v37_v18 }
  0x74   :  { %v68_v21 = vpop.permute.xlu0 %67 }
  0x75   :  { %vm72_vm3 = vcmp.eq.s32.totalorder %v917_v20, %v68_v21  ;;  %v56_v26 = vpop.permute.xlu1 %55 }
  0x76   :  { %v715_v23 = vsel %vm72_vm3, 1.0, %v813_v22  ;;  %vm60_vm5 = vcmp.eq.s32.totalorder %v917_v20, %v56_v26 }
  0x77   :  { %718 = vmatmul.msk.f32.vlgmr.msra.gmra.mxu1 %vm78_vm2, %v715_v23  ;;  %v713_v27 = vsel %vm60_vm5, 1.0, %v813_v22 }
  0x7c   :  { %v71_v24 = vpop.permute.xlu0 %70 }
  0x7d   :  { %vm73_vm4 = vcmp.eq.s32.totalorder %v917_v20, %v71_v24  ;;  %v59_v28 = vpop.permute.xlu1 %58 }
  0x7e   :  { %v716_v25 = vsel %vm73_vm4, 1.0, %v813_v22  ;;  %vm61_vm7 = vcmp.eq.s32.totalorder %v917_v20, %v59_v28 }
  0x7f   :  { %719 = vmatmul.msk.f32.gmra.mxu1 %vm78_vm2, %v716_v25  ;;  %v714_v29 = vsel %vm61_vm7, 1.0, %v813_v22 }
  0x87   :  { %721 = vmatmul.msk.f32.vlgmr.msrb.gmra.mxu1 %vm112_vm6, %v713_v27 }
  0x8f   :  { %722 = vmatmul.msk.f32.gmra.mxu1 %vm112_vm6, %v714_v29 }
  0xf4   :  { %v106_v30 = vpop.f32.mrf.mxu1 }
  0xfc   :  { %v109_v31 = vpop.f32.mrf.mxu1 }
 0x104   :  { %v140_v32 = vpop.f32.mrf.mxu1 }
 0x105   :  { %v141_v34 = vadd.f32 %v140_v32, %v106_v30  ;;  %v975_v30 = vld [vmem:[%s1149_s7] sm:$0xff] }
 0x106   :  { %v260_v44 = vperm.slane %v975_v30, 4 }
 0x107   :  { %v146_v35 = vadd.f32 %v141_v34, %v51_v33 }
 0x109   :  { %v149_v36 = vsel %vm148_vm8, %v146_v35, 0.0 }
 0x10a   :  { %150 = vadd.xlane.f32.xlu2 %v149_v36 }
 0x10c   :  { %v143_v37 = vpop.f32.mrf.mxu1 }
 0x10d   :  { %v144_v38 = vadd.f32 %v143_v37, %v109_v31 }
 0x10f   :  { %v147_v39 = vadd.f32 %v144_v38, %v51_v33  ;;  %v200_v33 = vperm.slane %v975_v30, 0  ;;  %v203_v38 = vperm.slane %v975_v30, 1 }
 0x111   :  { %v152_v40 = vsel %vm148_vm8, %v147_v39, 0.0 }
 0x112   :  { %153 = vadd.xlane.f32.xlu2 %v152_v40 }
 0x12a   :  { %321 = vperm.xlu2 %757, %v319_v43  }
 0x17d   :  { %v151_v48 = vpop.xlane.xlu2 %150 }
 0x17e   :  { %v162_v49 = vmul.f32 %v928_v47, %v151_v48  ;;  %v238_v48 = vperm.slane %v975_v30, 3 }
 0x180   :  { %v164_v50 = vsub.f32 %v146_v35, %v162_v49 }
 0x182   :  { %v166_v51 = vmul.f32 %v164_v50, %v164_v50 }
 0x184   :  { %v168_v52 = vsel %vm148_vm8, %v166_v51, 0.0 }
 0x185   :  { %169 = vadd.xlane.f32.xlu0 %v168_v52  ;;  %v154_v53 = vpop.xlane.xlu2 %153 }
 0x186   :  { %v163_v54 = vmul.f32 %v928_v47, %v154_v53 }
 0x188   :  { %v165_v55 = vsub.f32 %v147_v39, %v163_v54  ;;  %v213_v54 = vperm.slane %v975_v30, 2 }
 0x18a   :  { %v167_v56 = vmul.f32 %v165_v55, %v165_v55 }
 0x18c   :  { %v171_v57 = vsel %vm148_vm8, %v167_v56, 0.0 }
 0x18d   :  { %172 = vadd.xlane.f32.xlu1 %v171_v57 }
 0x1f8   :  { %v170_v6 = vpop.xlane.xlu0 %169 }
 0x1f9   :  { %v174_v11 = vmul.f32 %v170_v6, %v928_v47  ;;  %v322_v6 = vpop.permute.xlu2 %321 }
 0x1fa   :  { %vm323_vm0 = vcmp.lt.s32.totalorder %v917_v20, %v322_v6 }
 0x1fb   :  { %v176_v14 = vadd.f32 1e-12, %v174_v11  ;;  %v324_v8 = vsel %vm323_vm0, 0.0, %v815_v7 }
 0x1fc   :  { %v327_v9 = vperm.slane %v324_v8, 0  ;;  %v326_v12 = vrot.slane %v324_v8, 1 }
 0x1fd   :  { %760 = vrsqrt.f32 %v176_v14  ;;  %vm184_vm11 = vweird.f32 %v176_v14 }
 0x200   :  { %v173_v15 = vpop.xlane.xlu1 %172 }
 0x201   :  { %v175_v16 = vmul.f32 %v173_v15, %v928_v47  ;;  %v328_v15 = vperm.slane %v326_v12, 0 }
 0x203   :  { %v761_v17 = vpop.eup %760  ;;  %v177_v18 = vadd.f32 1e-12, %v175_v16 }
 0x204   :  { %v179_v19 = vmul.f32 %v761_v17, %v176_v14  ;;  %vm185_vm10 = vweird.f32 %v761_v17 }
 0x205   :  { %762 = vrsqrt.f32 %v177_v18  ;;  %vm186_vm12 = vmor %vm184_vm11, %vm185_vm10  ;;  %vm194_vm14 = vweird.f32 %v177_v18 }
 0x206   :  { %v180_v21 = vmul.f32 %v761_v17, %v179_v19 }
 0x208   :  { %v181_v22 = vmul.f32 0.5, %v180_v21 }
 0x20a   :  { %v182_v23 = vsub.f32 1.5, %v181_v22 }
 0x20b   :  { %v763_v24 = vpop.eup %762 }
 0x20c   :  { %v183_v25 = vmul.f32 %v761_v17, %v182_v23  ;;  %v189_v26 = vmul.f32 %v763_v24, %v177_v18  ;;  %vm195_vm13 = vweird.f32 %v763_v24 }
 0x20d   :  { %vm196_vm15 = vmor %vm194_vm14, %vm195_vm13 }
 0x20e   :  { %v190_v27 = vmul.f32 %v763_v24, %v189_v26  ;;  %v187_v28 = vsel %vm186_vm12, %v761_v17, %v183_v25 }
 0x20f   :  { %v198_v32 = vmul.f32 %v187_v28, %v164_v50 }
 0x210   :  { %v191_v29 = vmul.f32 0.5, %v190_v27 }
 0x211   :  { %v201_v37 = vmul.f32 %v200_v33, %v198_v32 }
 0x212   :  { %v192_v31 = vsub.f32 1.5, %v191_v29 }
 0x213   :  { %v979_v40 = vadd.f32 %v203_v38, %v201_v37 }
 0x214   :  { %v193_v34 = vmul.f32 %v763_v24, %v192_v31 }
 0x216   :  { %v197_v35 = vsel %vm196_vm15, %v763_v24, %v193_v34 }
 0x217   :  { %v199_v36 = vmul.f32 %v197_v35, %v165_v55 }
 0x219   :  { %v202_v39 = vmul.f32 %v200_v33, %v199_v36 }
 0x21b   :  { %v981_v41 = vadd.f32 %v203_v38, %v202_v39 }
 0x21d   :  { %v210_v42 = vpack.c.bf16 %v981_v41, %v979_v40 }
 0x21f   :  { %723 = vmatmul.msk.bf16.vlgmr.msra.gmra.mxu2 %vm148_vm8, %v210_v42  ;;  %728 = vmatmul.msk.bf16.vlgmr.msra.gmra.mxu3 %vm148_vm8, %v210_v42 }
 0x220   :  { %733 = vmatmul.msk.bf16.vlgmr.msra.gmra.mxu0 %vm148_vm8, %v210_v42 }
 0x29d   :  { %v270_v45 = vpop.f32.mrf.mxu0 }
 0x29e   :  { %v271_v46 = vadd.f32 %v270_v45, %v260_v44 }
 0x2a0   :  { %v384_v49 = vpack.c.bf16 %v271_v46, %v271_v46 }
 0x2a2   :  { %v248_v50 = vpop.f32.mrf.mxu3  ;;  %v390_v51 = vsel %vm119_vm1, %v384_v49, 0  ;;  %v226_v53 = vpop.f32.mrf.mxu2 }
 0x2a3   :  { %v249_v52 = vadd.f32 %v248_v50, %v238_v48  ;;  %399 = vmatpush.bf16.msrb.mxu0 %v390_v51  ;;  %v227_v60 = vadd.f32 %v226_v53, %v213_v54 }
 0x2a5   :  { %v277_v55 = vpack.c.bf16 %v249_v52, %v249_v52  ;;  %v272_v56 = vpop.f32.mrf.mxu0  ;;  %v275_v0 = vpack.c.bf16 %v227_v60, %v227_v60 }
 0x2a6   :  { %v273_v57 = vadd.f32 %v272_v56, %v260_v44 }
 0x2a7   :  { %v283_v58 = vsel %vm148_vm8, %v277_v55, 0 }
 0x2a8   :  { %v385_v59 = vpack.c.bf16 %v273_v57, %v273_v57  ;;  %292 = vmatpush.bf16.xpose.msrb.mxu2 %v283_v58 }
 0x2aa   :  { %v409_v61 = vsel %vm119_vm1, %v385_v59, 0  ;;  %v250_v62 = vpop.f32.mrf.mxu3  ;;  %v228_v2 = vpop.f32.mrf.mxu2  ;;  %vm333_vm1 = vcmask 64512  }
 0x2ab   :  { %v251_v63 = vadd.f32 %v250_v62, %v238_v48  ;;  %v229_v4 = vadd.f32 %v228_v2, %v213_v54  ;;  %v740_v62 = vld [vmem:[%s1146_s4 + $0x70] sm:$0xff]  ;;  %v739_v2 = vld [vmem:[%s1146_s4 + $0x68] sm:$0xff] }
 0x2ad   :  { %v278_v1 = vpack.c.bf16 %v251_v63, %v251_v63  ;;  %v276_v5 = vpack.c.bf16 %v229_v4, %v229_v4  ;;  %v741_v63 = vld [vmem:[%s1146_s4 + $0x78] sm:$0xff] }
 0x2af   :  { %734 = vmatmul.msk.bf16.vlgmr.msrb.gmra.mxu2 %vm148_vm8, %v275_v0  ;;  %v302_v3 = vsel %vm148_vm8, %v278_v1, 0  ;;  %v431_v0 = vpack.c.bf16 %v741_v63, %v740_v62  ;;  %v738_v1 = vld [vmem:[%s1146_s4 + $0x60] sm:$0xff] }
 0x2b0   :  { %418 = vmatpush.bf16.msra.mxu2 %v409_v61  ;;  %311 = vmatpush.bf16.xpose.msrb.mxu3 %v302_v3  ;;  %v430_v3 = vpack.c.bf16 %v739_v2, %v738_v1  ;;  %v559_v1 = vld [vmem:[%s1148_s6 + $0x70] sm:$0xff] }
 0x2b7   :  { %735 = vmatmul.msk.bf16.vlgmr.msrb.gmra.mxu3 %vm148_vm8, %v276_v5 }
 0x2b8   :  { %442 = vmatpush.bf16.msra.mxu3 %v431_v0 }
 0x2bc   :  { %443 = vmatpush.bf16.msra.mxu3 %v430_v3  ;;  %v557_v3 = vld [vmem:[%s1148_s6 + $0x60] sm:$0xff] }
 0x332   :  { %v294_v10 = vpop.f32.mrf.mxu2 }
 0x333   :  { %v317_v11 = vmul.f32 0.17677669, %v294_v10 }
 0x335   :  { %v331_v13 = vadd.f32 %v327_v9, %v317_v11  ;;  %v432_v9 = vperm.slane %v975_v30, 5 }
 0x337   :  { %v334_v14 = vsel %vm333_vm1, %v331_v13, -inf }
 0x338   :  { %335 = vmax.xlane.f32.xlu0 %v334_v14 }
 0x33a   :  { %v296_v16 = vpop.f32.mrf.mxu2  ;;  %v313_v17 = vpop.f32.mrf.mxu3 }
 0x33b   :  { %v318_v18 = vmul.f32 0.17677669, %v313_v17 }
 0x33d   :  { %v332_v19 = vadd.f32 %v328_v15, %v318_v18 }
 0x33f   :  { %v337_v21 = vsel %vm333_vm1, %v332_v19, -inf }
 0x340   :  { %338 = vmax.xlane.f32.xlu2 %v337_v21 }
 0x342   :  { %v315_v20 = vpop.f32.mrf.mxu3 }
 0x3ab   :  { %v336_v22 = vpop.xlane.xlu0 %335 }
 0x3ac   :  { %v340_v23 = vsub.f32 %v331_v13, %v336_v22 }
 0x3ae   :  { %v342_v24 = vmul.f32 1.442695, %v340_v23 }
 0x3b0   :  { %764 = vpow2.f32 %v342_v24 }
 0x3b3   :  { %v339_v25 = vpop.xlane.xlu2 %338 }
 0x3b4   :  { %v341_v26 = vsub.f32 %v332_v19, %v339_v25 }
 0x3b6   :  { %v765_v27 = vpop.eup %764  ;;  %v344_v28 = vmul.f32 1.442695, %v341_v26 }
 0x3b7   :  { %v346_v29 = vsel %vm333_vm1, %v765_v27, 0.0 }
 0x3b8   :  { %766 = vpow2.f32 %v344_v28  ;;  %347 = vadd.xlane.f32.xlu0 %v346_v29 }
 0x3be   :  { %v767_v31 = vpop.eup %766 }
 0x3bf   :  { %v349_v32 = vsel %vm333_vm1, %v767_v31, 0.0 }
 0x3c0   :  { %350 = vadd.xlane.f32.xlu1 %v349_v32  ;;  %v502_v32 = vld [vmem:[%s1147_s5] sm:$0xff] }
 0x42b   :  { %v348_v33 = vpop.xlane.xlu0 %347 }
 0x42c   :  { %768 = vrcp.f32 %v348_v33  ;;  %v363_v38 = vand.u32 2147483648, %v348_v33  ;;  %v361_v42 = vand.u32 2147483647, %v348_v33  ;;  %vm357_vm3 = vweird.f32 %v348_v33 }
 0x42e   :  { %v364_v45 = vor.u32 1.1754944e-38, %v363_v38  ;;  %vm362_vm5 = vcmp.eq.f32.partialorder %v361_v42, 8.507059e+37 }
 0x432   :  { %v769_v34 = vpop.eup %768 }
 0x433   :  { %v353_v35 = vmul.f32 %v769_v34, %v348_v33  ;;  %v351_v36 = vpop.xlane.xlu1 %350  ;;  %vm358_vm2 = vweird.f32 %v769_v34  ;;  %v503_v33 = vld [vmem:[%s1147_s5 + $0x8] sm:$0xff] }
 0x434   :  { %770 = vrcp.f32 %v351_v36  ;;  %vm359_vm4 = vmor %vm357_vm3, %vm358_vm2  ;;  %v377_v52 = vand.u32 2147483648, %v351_v36  ;;  %v375_v54 = vand.u32 2147483647, %v351_v36  ;;  %vm371_vm7 = vweird.f32 %v351_v36 }
 0x435   :  { %v354_v37 = vsub.f32 1.0, %v353_v35  ;;  %v507_v35 = vpack.c.bf16 %v503_v33, %v502_v32 }
 0x436   :  { %v378_v57 = vor.u32 1.1754944e-38, %v377_v52  ;;  %vm376_vm10 = vcmp.eq.f32.partialorder %v375_v54, 8.507059e+37  ;;  %v496_v54 = vperm.slane %v975_v30, 6 }
 0x437   :  { %v355_v39 = vmul.f32 %v769_v34, %v354_v37 }
 0x439   :  { %v356_v43 = vadd.f32 %v769_v34, %v355_v39 }
 0x43a   :  { %v771_v44 = vpop.eup %770 }
 0x43b   :  { %v367_v46 = vmul.f32 %v771_v44, %v351_v36  ;;  %v360_v48 = vsel %vm359_vm4, %v769_v34, %v356_v43  ;;  %vm372_vm6 = vweird.f32 %v771_v44 }
 0x43c   :  { %v365_v49 = vsel %vm362_vm5, %v364_v45, %v360_v48  ;;  %vm373_vm9 = vmor %vm371_vm7, %vm372_vm6  ;;  %vm652_vm7 = vcmask 1041409  }
 0x43d   :  { %v368_v50 = vsub.f32 1.0, %v367_v46  ;;  %v380_v51 = vmul.f32 %v765_v27, %v365_v49  ;;  %v505_v27 = vld [vmem:[%s1147_s5 + $0x18] sm:$0xff] }
 0x43f   :  { %v369_v53 = vmul.f32 %v771_v44, %v368_v50  ;;  %v382_v55 = vpack.c.bf16 %v380_v51, %v380_v51 }
 0x441   :  { %v370_v56 = vadd.f32 %v771_v44, %v369_v53  ;;  %736 = vmatmul.msk.bf16.vlgmr.msrb.gmra.mxu0 %vm333_vm1, %v382_v55 }
 0x443   :  { %v374_v58 = vsel %vm373_vm9, %v771_v44, %v370_v56  ;;  %vm695_vm9 = vcmask 9216  }
 0x444   :  { %v379_v59 = vsel %vm376_vm10, %v378_v57, %v374_v58  ;;  %v499_v58 = vperm.slane %v975_v30, 7  ;;  %v560_v30 = vld [vmem:[%s1148_s6 + $0x78] sm:$0xff] }
 0x445   :  { %v381_v60 = vmul.f32 %v767_v31, %v379_v59  ;;  %v569_v2 = vpack.c.bf16 %v560_v30, %v559_v1 }
 0x447   :  { %v383_v61 = vpack.c.bf16 %v381_v60, %v381_v60  ;;  %571 = vmatpush.bf16.msra.mxu0 %v569_v2 }
 0x449   :  { %737 = vmatmul.msk.bf16.vlgmr.msra.gmra.mxu2 %vm333_vm1, %v383_v61 }
 0x4be   :  { %v401_v4 = vpop.f32.mrf.mxu0 }
 0x4c6   :  { %v403_v5 = vpop.f32.mrf.mxu0 }
 0x4cc   :  { %v420_v6 = vpop.f32.mrf.mxu2 }
 0x4cd   :  { %v429_v7 = vpack.c.bf16 %v420_v6, %v401_v4  ;;  %v558_v4 = vld [vmem:[%s1148_s6 + $0x68] sm:$0xff]  ;;  %v555_v6 = vld [vmem:[%s1148_s6 + $0x50] sm:$0xff] }
 0x4ce   :  { %v568_v5 = vpack.c.bf16 %v558_v4, %v557_v3 }
 0x4cf   :  { %742 = vmatmul.msk.bf16.vlgmr.msra.gmra.mxu3 %vm148_vm8, %v429_v7  ;;  %v556_v7 = vld [vmem:[%s1148_s6 + $0x58] sm:$0xff] }
 0x4d0   :  { %572 = vmatpush.bf16.msra.mxu0 %v568_v5 }
 0x4d4   :  { %v422_v8 = vpop.f32.mrf.mxu2 }
 0x4d5   :  { %v567_v8 = vpack.c.bf16 %v556_v7, %v555_v6 }
 0x4d7   :  { %573 = vmatpush.bf16.msra.mxu0 %v567_v8  ;;  %v746_v8 = vld [vmem:[%s1146_s4 + $0x90] sm:$0xff] }
 0x552   :  { %v445_v10 = vpop.f32.mrf.mxu3 }
 0x553   :  { %v446_v11 = vadd.f32 %v445_v10, %v432_v9  ;;  %v554_v10 = vld [vmem:[%s1148_s6 + $0x48] sm:$0xff] }
 0x555   :  { %v450_v12 = vadd.f32 %v446_v11, %v979_v40 }
 0x557   :  { %v452_v13 = vsel %vm148_vm8, %v450_v12, 0.0 }
 0x558   :  { %453 = vadd.xlane.f32.xlu1 %v452_v13  ;;  %v552_v13 = vld [vmem:[%s1148_s6 + $0x38] sm:$0xff] }
 0x55a   :  { %v447_v14 = vpop.f32.mrf.mxu3 }
 0x55b   :  { %v448_v15 = vadd.f32 %v447_v14, %v432_v9  ;;  %v553_v9 = vld [vmem:[%s1148_s6 + $0x40] sm:$0xff] }
 0x55c   :  { %v566_v11 = vpack.c.bf16 %v554_v10, %v553_v9  ;;  %v747_v9 = vld [vmem:[%s1146_s4 + $0x98] sm:$0xff] }
 0x55d   :  { %v451_v16 = vadd.f32 %v448_v15, %v981_v41  ;;  %v504_v41 = vld [vmem:[%s1147_s5 + $0x10] sm:$0xff]  ;;  %v549_v15 = vld [vmem:[%s1148_s6 + $0x20] sm:$0xff]  ;;  %v645_v10 = vpack.c.bf16 %v747_v9, %v746_v8 }
 0x55e   :  { %v508_v28 = vpack.c.bf16 %v505_v27, %v504_v41  ;;  %574 = vmatpush.bf16.msra.mxu0 %v566_v11 }
 0x55f   :  { %v455_v17 = vsel %vm148_vm8, %v451_v16, 0.0  ;;  %664 = vmatpush.bf16.msrb.mxu2 %v645_v10 }
 0x560   :  { %456 = vadd.xlane.f32.xlu0 %v455_v17  ;;  %519 = vmatpush.bf16.msra.mxu1 %v508_v28 }
 0x564   :  { %520 = vmatpush.bf16.msra.mxu1 %v507_v35 }
 0x5cb   :  { %v454_v18 = vpop.xlane.xlu1 %453 }
 0x5cc   :  { %v458_v19 = vmul.f32 %v454_v18, %v928_v47  ;;  %v1091_v18 = vld [vmem:[%s1149_s7 + $0x8] sm:$0x3f] }
 0x5ce   :  { %v460_v21 = vsub.f32 %v450_v12, %v458_v19  ;;  %v551_v12 = vld [vmem:[%s1148_s6 + $0x30] sm:$0xff] }
 0x5cf   :  { %v565_v14 = vpack.c.bf16 %v552_v13, %v551_v12  ;;  %v547_v19 = vld [vmem:[%s1148_s6 + $0x10] sm:$0xff]  ;;  %v744_v13 = vld [vmem:[%s1146_s4 + $0x80] sm:$0xff] }
 0x5d0   :  { %v462_v20 = vmul.f32 %v460_v21, %v460_v21 }
 0x5d1   :  { %575 = vmatpush.bf16.msra.mxu0 %v565_v14  ;;  %v745_v14 = vld [vmem:[%s1146_s4 + $0x88] sm:$0xff] }
 0x5d2   :  { %v464_v22 = vsel %vm148_vm8, %v462_v20, 0.0 }
 0x5d3   :  { %v457_v23 = vpop.xlane.xlu0 %456  ;;  %465 = vadd.xlane.f32.xlu1 %v464_v22  ;;  %v509_v22 = vperm.slane %v1091_v18, 4 }
 0x5d4   :  { %v459_v40 = vmul.f32 %v457_v23, %v928_v47  ;;  %v545_v23 = vld [vmem:[%s1148_s6] sm:$0xff] }
 0x5d6   :  { %v461_v24 = vsub.f32 %v451_v16, %v459_v40  ;;  %v550_v16 = vld [vmem:[%s1148_s6 + $0x28] sm:$0xff] }
 0x5d7   :  { %v564_v17 = vpack.c.bf16 %v550_v16, %v549_v15  ;;  %v546_v40 = vld [vmem:[%s1148_s6 + $0x8] sm:$0xff]  ;;  %v644_v15 = vpack.c.bf16 %v745_v14, %v744_v13 }
 0x5d8   :  { %v463_v25 = vmul.f32 %v461_v24, %v461_v24 }
 0x5d9   :  { %576 = vmatpush.bf16.msra.mxu0 %v564_v17  ;;  %665 = vmatpush.bf16.msrb.mxu2 %v644_v15 }
 0x5da   :  { %v467_v26 = vsel %vm148_vm8, %v463_v25, 0.0  ;;  %v562_v25 = vpack.c.bf16 %v546_v40, %v545_v23 }
 0x5db   :  { %468 = vadd.xlane.f32.xlu2 %v467_v26 }
 0x646   :  { %v466_v29 = vpop.xlane.xlu1 %465 }
 0x647   :  { %v470_v31 = vmul.f32 %v466_v29, %v928_v47 }
 0x649   :  { %v472_v34 = vadd.f32 1e-12, %v470_v31 }
 0x64b   :  { %772 = vrsqrt.f32 %v472_v34  ;;  %vm480_vm12 = vweird.f32 %v472_v34 }
 0x64e   :  { %v469_v36 = vpop.xlane.xlu2 %468 }
 0x64f   :  { %v471_v37 = vmul.f32 %v469_v36, %v928_v47 }
 0x651   :  { %v773_v38 = vpop.eup %772  ;;  %v473_v39 = vadd.f32 1e-12, %v471_v37 }
 0x652   :  { %v475_v42 = vmul.f32 %v773_v38, %v472_v34  ;;  %vm481_vm11 = vweird.f32 %v773_v38 }
 0x653   :  { %774 = vrsqrt.f32 %v473_v39  ;;  %vm482_vm13 = vmor %vm480_vm12, %vm481_vm11  ;;  %vm490_vm15 = vweird.f32 %v473_v39 }
 0x654   :  { %v476_v43 = vmul.f32 %v773_v38, %v475_v42 }
 0x656   :  { %v477_v44 = vmul.f32 0.5, %v476_v43 }
 0x658   :  { %v478_v45 = vsub.f32 1.5, %v477_v44 }
 0x659   :  { %v775_v46 = vpop.eup %774 }
 0x65a   :  { %v479_v48 = vmul.f32 %v773_v38, %v478_v45  ;;  %v485_v49 = vmul.f32 %v775_v46, %v473_v39  ;;  %vm491_vm14 = vweird.f32 %v775_v46 }
 0x65b   :  { %vm492_vm0 = vmor %vm490_vm15, %vm491_vm14 }
 0x65c   :  { %v486_v50 = vmul.f32 %v775_v46, %v485_v49  ;;  %v483_v51 = vsel %vm482_vm13, %v773_v38, %v479_v48 }
 0x65d   :  { %v494_v55 = vmul.f32 %v483_v51, %v460_v21  ;;  %v548_v21 = vld [vmem:[%s1148_s6 + $0x18] sm:$0xff]  ;;  %v570_v51 = vperm.slane %v1091_v18, 0 }
 0x65e   :  { %v487_v52 = vmul.f32 0.5, %v486_v50  ;;  %v563_v20 = vpack.c.bf16 %v548_v21, %v547_v19 }
 0x65f   :  { %v497_v59 = vmul.f32 %v496_v54, %v494_v55 }
 0x660   :  { %v488_v53 = vsub.f32 1.5, %v487_v52  ;;  %577 = vmatpush.bf16.msra.mxu0 %v563_v20 }
 0x661   :  { %v1045_v62 = vadd.f32 %v499_v58, %v497_v59 }
 0x662   :  { %v489_v56 = vmul.f32 %v775_v46, %v488_v53 }
 0x664   :  { %v493_v57 = vsel %vm492_vm0, %v775_v46, %v489_v56  ;;  %578 = vmatpush.bf16.msra.mxu0 %v562_v25 }
 0x665   :  { %v495_v60 = vmul.f32 %v493_v57, %v461_v24 }
 0x667   :  { %v498_v61 = vmul.f32 %v496_v54, %v495_v60 }
 0x669   :  { %v1047_v63 = vadd.f32 %v499_v58, %v498_v61 }
 0x66b   :  { %v506_v0 = vpack.c.bf16 %v1047_v63, %v1045_v62 }
 0x66d   :  { %743 = vmatmul.msk.bf16.vlgmr.msra.gmra.mxu1 %vm148_vm8, %v506_v0 }
 0x6ea   :  { %v522_v24 = vpop.f32.mrf.mxu1 }
 0x6eb   :  { %v523_v26 = vadd.f32 %v522_v24, %v509_v22 }
 0x6ed   :  { %v527_v41 = vmul.f32 %v523_v26, %v523_v26 }
 0x6ef   :  { %v529_v27 = vmul.f32 %v527_v41, %v523_v26  ;;  %v631_v41 = vperm.slane %v1091_v18, 1 }
 0x6f1   :  { %v531_v28 = vmul.f32 0.044715, %v529_v27 }
 0x6f2   :  { %v524_v29 = vpop.f32.mrf.mxu1 }
 0x6f3   :  { %v533_v31 = vadd.f32 %v531_v28, %v523_v26  ;;  %v525_v32 = vadd.f32 %v524_v29, %v509_v22 }
 0x6f5   :  { %v535_v33 = vmul.f32 0.7978846, %v533_v31  ;;  %v528_v34 = vmul.f32 %v525_v32, %v525_v32  ;;  %v634_v31 = vperm.slane %v1091_v18, 2 }
 0x6f7   :  { %v530_v35 = vmul.f32 %v528_v34, %v525_v32  ;;  %776 = vtanh.f32 %v535_v33 }
 0x6f9   :  { %v532_v36 = vmul.f32 0.044715, %v530_v35 }
 0x6fb   :  { %v534_v37 = vadd.f32 %v532_v36, %v525_v32 }
 0x6fd   :  { %v536_v38 = vmul.f32 0.7978846, %v534_v37  ;;  %v777_v39 = vpop.eup %776 }
 0x6fe   :  { %v539_v42 = vadd.f32 1.0, %v777_v39 }
 0x6ff   :  { %778 = vtanh.f32 %v536_v38 }
 0x700   :  { %v541_v44 = vmul.f32 0.5, %v539_v42 }
 0x702   :  { %v543_v48 = vmul.f32 %v541_v44, %v523_v26 }
 0x705   :  { %v779_v43 = vpop.eup %778 }
 0x706   :  { %v540_v45 = vadd.f32 1.0, %v779_v43 }
 0x708   :  { %v542_v46 = vmul.f32 0.5, %v540_v45 }
 0x70a   :  { %v544_v49 = vmul.f32 %v542_v46, %v525_v32 }
 0x70c   :  { %v561_v50 = vpack.c.bf16 %v544_v49, %v543_v48  ;;  %v672_v48 = vld [vmem:[%s1148_s6 + $0x80] sm:$0x3] }
 0x70d   :  { %v674_v49 = vpack.c.bf16 %v672_v48, %v672_v48 }
 0x70e   :  { %579 = vmatmul.bf16.vlgmr.msra.gmra.mxu0 %v561_v50 }
 0x70f   :  { %v680_v50 = vsel %vm148_vm8, %v674_v49, 0 }
 0x710   :  { %689 = vmatpush.bf16.xpose.msrb.mxu3 %v680_v50 }
 0x78b   :  { %v580_v52 = vpop.f32.mrf.mxu0 }
 0x78c   :  { %v581_v53 = vadd.f32 %v580_v52, %v570_v51 }
 0x78e   :  { %v585_v54 = vadd.f32 %v581_v53, %v1045_v62 }
 0x790   :  { %v587_v55 = vsel %vm148_vm8, %v585_v54, 0.0 }
 0x791   :  { %588 = vadd.xlane.f32.xlu1 %v587_v55 }
 0x793   :  { %v582_v56 = vpop.f32.mrf.mxu0 }
 0x794   :  { %v583_v57 = vadd.f32 %v582_v56, %v570_v51  ;;  %v646_v51 = vperm.slane %v1091_v18, 3 }
 0x796   :  { %v586_v58 = vadd.f32 %v583_v57, %v1047_v63  ;;  %v675_v57 = vperm.slane %v1091_v18, 5 }
 0x798   :  { %v590_v59 = vsel %vm148_vm8, %v586_v58, 0.0 }
 0x799   :  { %591 = vadd.xlane.f32.xlu0 %v590_v59 }
 0x804   :  { %v589_v60 = vpop.xlane.xlu1 %588 }
 0x805   :  { %v593_v61 = vmul.f32 %v589_v60, %v928_v47 }
 0x807   :  { %v595_v0 = vsub.f32 %v585_v54, %v593_v61 }
 0x809   :  { %v597_v1 = vmul.f32 %v595_v0, %v595_v0 }
 0x80b   :  { %v599_v30 = vsel %vm148_vm8, %v597_v1, 0.0 }
 0x80c   :  { %v592_v2 = vpop.xlane.xlu0 %591  ;;  %600 = vadd.xlane.f32.xlu0 %v599_v30 }
 0x80d   :  { %v594_v62 = vmul.f32 %v592_v2, %v928_v47 }
 0x80f   :  { %v596_v3 = vsub.f32 %v586_v58, %v594_v62 }
 0x811   :  { %v598_v4 = vmul.f32 %v596_v3, %v596_v3 }
 0x813   :  { %v602_v5 = vsel %vm148_vm8, %v598_v4, 0.0 }
 0x814   :  { %603 = vadd.xlane.f32.xlu2 %v602_v5 }
 0x87f   :  { %v601_v63 = vpop.xlane.xlu0 %600 }
 0x880   :  { %v605_v6 = vmul.f32 %v601_v63, %v928_v47 }
 0x882   :  { %v607_v7 = vadd.f32 1e-12, %v605_v6 }
 0x884   :  { %780 = vrsqrt.f32 %v607_v7  ;;  %vm615_vm2 = vweird.f32 %v607_v7 }
 0x887   :  { %v604_v11 = vpop.xlane.xlu2 %603 }
 0x888   :  { %v606_v12 = vmul.f32 %v604_v11, %v928_v47 }
 0x88a   :  { %v781_v16 = vpop.eup %780  ;;  %v608_v17 = vadd.f32 1e-12, %v606_v12 }
 0x88b   :  { %v610_v19 = vmul.f32 %v781_v16, %v607_v7  ;;  %vm616_vm1 = vweird.f32 %v781_v16 }
 0x88c   :  { %782 = vrsqrt.f32 %v608_v17  ;;  %vm617_vm3 = vmor %vm615_vm2, %vm616_vm1  ;;  %vm625_vm5 = vweird.f32 %v608_v17 }
 0x88d   :  { %v611_v21 = vmul.f32 %v781_v16, %v610_v19 }
 0x88f   :  { %v612_v20 = vmul.f32 0.5, %v611_v21 }
 0x891   :  { %v613_v22 = vsub.f32 1.5, %v612_v20 }
 0x892   :  { %v783_v23 = vpop.eup %782 }
 0x893   :  { %v614_v47 = vmul.f32 %v781_v16, %v613_v22  ;;  %v620_v40 = vmul.f32 %v783_v23, %v608_v17  ;;  %vm626_vm4 = vweird.f32 %v783_v23 }
 0x894   :  { %vm627_vm6 = vmor %vm625_vm5, %vm626_vm4 }
 0x895   :  { %v618_v24 = vsel %vm617_vm3, %v781_v16, %v614_v47  ;;  %v621_v25 = vmul.f32 %v783_v23, %v620_v40 }
 0x896   :  { %v629_v27 = vmul.f32 %v618_v24, %v595_v0 }
 0x897   :  { %v622_v26 = vmul.f32 0.5, %v621_v25 }
 0x898   :  { %v632_v32 = vmul.f32 %v631_v41, %v629_v27 }
 0x899   :  { %v623_v28 = vsub.f32 1.5, %v622_v26 }
 0x89a   :  { %v635_v35 = vadd.f32 %v634_v31, %v632_v32 }
 0x89b   :  { %v624_v29 = vmul.f32 %v783_v23, %v623_v28 }
 0x89c   :  { %v642_v38 = vpack.c.bf16 %v635_v35, %v635_v35 }
 0x89d   :  { %v628_v33 = vsel %vm627_vm6, %v783_v23, %v624_v29 }
 0x89e   :  { %v630_v34 = vmul.f32 %v628_v33, %v596_v3  ;;  %v649_v43 = vunpack.c.l.b16 %v642_v38 }
 0x8a0   :  { %v633_v36 = vmul.f32 %v631_v41, %v630_v34 }
 0x8a2   :  { %v636_v37 = vadd.f32 %v634_v31, %v633_v36 }
 0x8a4   :  { %v643_v39 = vpack.c.bf16 %v636_v37, %v636_v37 }
 0x8a6   :  { %v650_v42 = vunpack.c.l.b16 %v643_v39 }
 0x8a8   :  { %v651_v44 = vrot.slane %v650_v42, 7 }
 0x8aa   :  { %v653_v45 = vsel %vm652_vm7, %v651_v44, %v649_v43 }
 0x8ab   :  { %v654_v46 = vpack.c.b16 %v653_v45, %v653_v45 }
 0x8ad   :  { %748 = vmatmul.msk.bf16.vlgmr.msrb.gmra.mxu2 %vm148_vm8, %v654_v46 }
 0x930   :  { %v667_v52 = vpop.f32.mrf.mxu2 }
 0x931   :  { %v668_v53 = vadd.f32 %v667_v52, %v646_v51 }
 0x933   :  { %784 = vtanh.f32 %v668_v53 }
 0x938   :  { %v669_v54 = vpop.f32.mrf.mxu2 }
 0x939   :  { %v785_v55 = vpop.eup %784 }
 0x93a   :  { %v673_v56 = vpack.c.bf16 %v785_v55, %v785_v55 }
 0x93c   :  { %749 = vmatmul.msk.bf16.vlgmr.msrb.gmra.mxu3 %vm148_vm8, %v673_v56 }
 0x9bf   :  { %v691_v58 = vpop.f32.mrf.mxu3 }
 0x9c0   :  { %v692_v59 = vadd.f32 %v691_v58, %v675_v57 }
 0x9c2   :  { %696 = vst.msk [vmem:[#allocation2] sm:$0x3] %vm695_vm9, %v692_v59 }
 0x9c3   :  { %707 = dma.vmem_to_hbm [thread:$0]  %s703_s25, 32, %s705_s1, [#allocation3]  }
 0x9c7   :  { %v693_v60 = vpop.f32.mrf.mxu3 }
 0x9c8   :  { %810 = dma.done.wait [#allocation3], 32  }
 0x9c9   :  { %811 = vsyncadd [#allocation3], 4294967264 }
 0x9ca   :  { %712 = vsyncpa [#allocation3], 1 }

</bundles_post_ra>
